<compile_context>
chip_gen: v7x
topology: tpu7x:2x2x1
jax: 0.10.0
libtpu: 0.0.40
codegen_flags: <defaults>
</compile_context>

<pallas_src>
import functools

import jax
import jax.numpy as jnp
from jax.experimental import pallas as pl
from jax.experimental.pallas import tpu as pltpu


def _round_up(x, m):
    return ((x + m - 1) // m) * m


def _rmsnorm_kernel(x_ref, o_ref, *, eps, inv_hidden):
    # x_ref / o_ref: (row_tile, hidden_padded) VMEM tiles.
    x = x_ref[...].astype(jnp.float32)
    # Sum-of-squares over lanes (XLU) divided by the TRUE hidden size, so any
    # zero-padded lanes (hidden padded to a 128 multiple) don't perturb the mean.
    ss = jnp.sum(x * x, axis=-1, keepdims=True)
    inv = jax.lax.rsqrt(ss * inv_hidden + eps)      # rsqrt -> EUP (free slot)
    o_ref[...] = (x * inv).astype(o_ref.dtype)
    # TODO(synk): for sub-32-bit inputs with very large hidden on v7x, switch to
    # a two-pass lane-chunked sum-of-squares (f32 (row_tile,1) accumulator) to
    # halve the in-kernel f32 footprint, and/or split hidden over a second
    # "arbitrary" grid axis.


def _row_packing(dtype):
    # Rows packed per sublane group: 8 for 32-bit, 16 for bf16, 32 for int8/fp8.
    itemsize = jnp.dtype(dtype).itemsize
    return max(8, 32 // max(itemsize, 1))


def _vmem_capacity_bytes():
    try:
        return int(pltpu.get_tpu_info().vmem_capacity_bytes)
    except Exception:
        return 128 << 20   # conservative fallback (v5e/v6e class)


def _budgets():
    """(io_budget_bytes, vmem_limit_bytes), generation aware."""
    cap = _vmem_capacity_bytes()
    if cap >= (96 << 20):           # v5e / v6e: 128 MiB physical VMEM
        return 44 << 20, 64 << 20
    else:                           # v7x: 64 MiB per TensorCore
        return 22 << 20, 36 << 20


def _pick_row_tile(rows, hidden, dtype, io_budget_bytes):
    """Largest sublane-packed row tile whose double-buffered in+out blocks plus
    in-kernel f32 working set fit the IO budget, then split so the grid has at
    least 2 steps (keeps both v7x TensorCores busy)."""
    itemsize = jnp.dtype(dtype).itemsize
    pack = _row_packing(dtype)
    # 2x double-buffered input + 2x double-buffered output blocks (4*itemsize)
    # plus f32 working headroom: ~4 B/elem for f32 (upcast is an alias),
    # ~8 B/elem for sub-32-bit dtypes (f32 copy + f32 result before downcast).
    headroom = 4 if itemsize >= 4 else 8
    bytes_per_row = hidden * (4 * itemsize + headroom)
    tile = max(pack, io_budget_bytes // max(bytes_per_row, 1))
    tile = (tile // pack) * pack
    # Never request more rows per block than the (packing-rounded) input has.
    needed = _round_up(rows, pack)
    tile = min(tile, needed)
    # v7x megacore: guarantee >= 2 grid steps whenever rows can be split.
    if tile >= rows and rows > pack:
        tile = min(tile, _round_up((rows + 1) // 2, pack))
    return max(pack, tile)


def rmsnorm(x, eps=1e-5, row_tile=None):
    """RMSNorm over the last axis of x (any rank >= 1), no learnable weight."""
    orig_shape = x.shape
    hidden = orig_shape[-1]
    rows = 1
    for d in orig_shape[:-1]:
        rows *= d
    x2d = x.reshape(rows, hidden)

    # Lane-dense guard: pad hidden to a 128 multiple when the waste is small.
    padded_hidden = hidden
    if hidden % 128 != 0:
        cand = _round_up(hidden, 128)
        if cand * 4 <= hidden * 5:          # <= 25% padding waste
            padded_hidden = cand
    if padded_hidden != hidden:
        x2d = jnp.pad(x2d, ((0, 0), (0, padded_hidden - hidden)))

    io_budget, vmem_limit = _budgets()
    if row_tile is None:
        row_tile = _pick_row_tile(rows, padded_hidden, x.dtype, io_budget)

    grid_steps = pl.cdiv(rows, row_tile)    # ragged last block masked by Pallas
    grid = (grid_steps,)

    itemsize = jnp.dtype(x.dtype).itemsize
    block_in_bytes = row_tile * padded_hidden * itemsize

    # Small blocks on long grids expose DMA issue latency -> triple-buffer input.
    if block_in_bytes <= (512 << 10) and grid_steps >= 4:
        in_spec = pl.BlockSpec((row_tile, padded_hidden), lambda i: (i, 0),
                               pipeline_mode=pl.Buffered(3))
    else:
        in_spec = pl.BlockSpec((row_tile, padded_hidden), lambda i: (i, 0))

    cost = pl.CostEstimate(
        flops=3 * rows * hidden,
        transcendentals=rows,
        bytes_accessed=2 * rows * hidden * itemsize,
    )

    kernel = functools.partial(_rmsnorm_kernel, eps=eps, inv_hidden=1.0 / hidden)

    out2d = pl.pallas_call(
        kernel,
        out_shape=jax.ShapeDtypeStruct((rows, padded_hidden), x.dtype),
        grid=grid,
        in_specs=[in_spec],
        out_specs=pl.BlockSpec((row_tile, padded_hidden), lambda i: (i, 0)),
        compiler_params=pltpu.CompilerParams(
            # Row axis is embarrassingly parallel -> shards across TCs on v7x.
            dimension_semantics=("parallel",),
            # Generation-aware scoped-VMEM limit (64 MiB on 128-MiB parts,
            # 36 MiB on v7x's 64-MiB-per-TC parts).
            vmem_limit_bytes=vmem_limit,
        ),
        cost_estimate=cost,
    )(x2d)

    if padded_hidden != hidden:
        out2d = out2d[:, :hidden]
    return out2d.reshape(orig_shape)


def _reference(x, eps=1e-5):
    xf = x.astype(jnp.float32)
    ms = jnp.mean(xf * xf, axis=-1, keepdims=True)
    return (xf * jax.lax.rsqrt(ms + eps)).astype(x.dtype)


if __name__ == "__main__":
    key = jax.random.PRNGKey(0)

    # Small shape consistent with the module's forward: (batch=2, seq=8, hidden=32).
    x = jax.random.normal(key, (2, 8, 32), dtype=jnp.float32)
    out = jax.block_until_ready(rmsnorm(x, eps=1e-5))
    ref = _reference(x, eps=1e-5)
    assert out.shape == x.shape and out.dtype == x.dtype
    assert jnp.allclose(out, ref, atol=1e-5, rtol=1e-5)

    # Ragged row count (rows=15 not a multiple of the 8-row pack) exercises the
    # masked last block (no host-side row padding).
    y = jax.random.normal(jax.random.PRNGKey(0), (3, 5, 128), dtype=jnp.float32)
    out_y = jax.block_until_ready(rmsnorm(y, eps=1e-5))
    ref_y = _reference(y, eps=1e-5)
    assert out_y.shape == y.shape and out_y.dtype == y.dtype
    assert jnp.allclose(out_y, ref_y, atol=1e-5, rtol=1e-5)

    # Moderate shape exercising the byte-based tile picker + 2-step megacore split.
    z = jax.random.normal(jax.random.PRNGKey(0), (4, 256, 512), dtype=jnp.float32)
    out_z = jax.block_until_ready(rmsnorm(z, eps=1e-5))
    ref_z = _reference(z, eps=1e-5)
    assert jnp.allclose(out_z, ref_z, atol=1e-5, rtol=1e-5)

    # bf16 input: upcast-to-f32 math, downcast on store (type_as semantics).
    w = jax.random.normal(jax.random.PRNGKey(0), (2, 8, 32), dtype=jnp.bfloat16)
    out_w = jax.block_until_ready(rmsnorm(w, eps=1e-5))
    ref_w = _reference(w, eps=1e-5)
    assert out_w.dtype == w.dtype
    assert jnp.allclose(out_w.astype(jnp.float32), ref_w.astype(jnp.float32),
                        atol=1e-2, rtol=1e-2)

    print("KERNEL_OK")
</pallas_src>

<mosaic_0001>
module attributes {stable_mosaic.version = 11 : i64} {
  func.func @_rmsnorm_kernel(%arg0: i32, %arg1: memref<8x32xf32, #tpu.memory_space<vmem>>, %arg2: memref<8x32xf32, #tpu.memory_space<vmem>>) attributes {dimension_semantics = [#tpu.dimension_semantics<parallel>], iteration_bounds = array<i64: 2>, scalar_prefetch = 0 : i64, scratch_operands = 0 : i64, tpu.core_type = #tpu.core_type<tc>, window_params = [{transform_indices = @transform_0, window_bounds = array<i64: 8, 32>}, {transform_indices = @transform_1, window_bounds = array<i64: 8, 32>}]} {
    %c0 = arith.constant 0 : index
    %c0_0 = arith.constant 0 : index
    %0 = vector.load %arg1[%c0, %c0_0] : memref<8x32xf32, #tpu.memory_space<vmem>>, vector<8x32xf32>
    %1 = arith.mulf %0, %0 : vector<8x32xf32>
    %cst = arith.constant dense<0.000000e+00> : vector<8xf32>
    %2 = vector.multi_reduction <add>, %1, %cst [1] : vector<8x32xf32> to vector<8xf32>
    %3 = vector.shape_cast %2 : vector<8xf32> to vector<8x1xf32>
    %cst_1 = arith.constant 3.125000e-02 : f32
    %4 = vector.broadcast %cst_1 : f32 to vector<8x1xf32>
    %5 = arith.mulf %3, %4 : vector<8x1xf32>
    %cst_2 = arith.constant 9.99999974E-6 : f32
    %6 = vector.broadcast %cst_2 : f32 to vector<8x1xf32>
    %7 = arith.addf %5, %6 : vector<8x1xf32>
    %8 = math.rsqrt %7 : vector<8x1xf32>
    %9 = vector.broadcast %8 : vector<8x1xf32> to vector<8x32xf32>
    %10 = arith.mulf %0, %9 : vector<8x32xf32>
    %c0_3 = arith.constant 0 : index
    %c0_4 = arith.constant 0 : index
    %11 = vector.load %arg2[%c0_3, %c0_4] : memref<8x32xf32, #tpu.memory_space<vmem>>, vector<8x32xf32>
    tpu.vector_store %arg2[%c0_3, %c0_4], %10 {strides = array<i32>} : memref<8x32xf32, #tpu.memory_space<vmem>>, vector<8x32xf32>,
    return
  }
  func.func @transform_0(%arg0: i32) -> (i32, i32) {
    %c0_i32 = arith.constant 0 : i32
    %c0_i32_0 = arith.constant 0 : i32
    return %arg0, %c0_i32 : i32, i32
  }
  func.func @transform_1(%arg0: i32) -> (i32, i32) {
    %c0_i32 = arith.constant 0 : i32
    %c0_i32_0 = arith.constant 0 : i32
    return %arg0, %c0_i32 : i32, i32
  }
}

</mosaic_0001>

<bundles_post_ra>
// kernel: tpu_custom_call.1
= control target key start
LH: loop header
LB: loop body
LE: loop exit
PB: predicated region body
PF: predicated region fallthrough
CT: control target
= control target key end

     0   :  { %6 = vsyncpa [#allocation3], 0  ;;  %s558_s0 = inlined_call_operand.hbm [shape: f32[16,32], index: 0, kind: input, shape index: {}]   ;;  %s559_s1 = inlined_call_operand.hbm [shape: f32[16,32], index: 1, kind: output, shape index: {}]  }
   0x1   :  { %8 = vsyncpa [#allocation3 + $0x1], 0 }
   0x2   :  { %9 = vsyncpa [#allocation4], 0 }
   0x3   :  { %11 = vsyncpa [#allocation4 + $0x1], 0  ;;  %s397_s6 = smov 0   ;;  %s399_s7 = smov 0  }
   0x4   :  { %s401_s8 = smov 0   ;;  %s403_s9 = smov 0  }
   0x5 LB: > { %s418_s10 = sadd.s32 4294967295, %s383_s9   ;;  %s227_s11 = sadd.s32 4294967294, %s383_s9   ;;  %s383_s9 = sphi %s403_s9, %s574_s9   ;;  %s379_s8 = sphi %s401_s8, %s573_s8   ;;  %s375_s7 = sphi %s399_s7, %s572_s7   ;;  %s371_s6 = sphi %s397_s6, %s571_s6  }
   0x6   : > { %s422_s12 = sadd.s32 1, %s383_s9   ;;  %s24_s13 = sadd.s32 1, %s379_s8 }
   0x7   : > { %s21_s14 = ssub.s32 %s383_s9, %s422_s12  ;;  %p31_p0 = scmp.ne.s32.totalorder %s379_s8, %s375_s7 }
   0x8   : > { %p22_p1 = scmp.eq.s32.totalorder %s21_s14, 0  ;;  %p32_p2 = scmp.eq.s32.totalorder %s383_s9, 0 }
   0x9   : > { %p37_p3 = scmp.ne.s32.totalorder %s375_s7, %s371_s6  ;;  %p38_p4 = scmp.eq.s32.totalorder %s418_s10, 0 }
   0xa   : > { %s434_s15 = scalar_select %p22_p1, %s379_s8, %s24_s13  }
   0xb   : > { %p436_p5 = por %p32_p2, %p31_p0  ;;  %p440_p6 = por %p38_p4, %p37_p3 }
   0xc   : > { %p61_p7 = scmp.eq.s32.totalorder %s418_s10, 1  ;;  %p67_p8 = scmp.eq.s32.totalorder %s227_s11, 1 }
   0xd   : > { %p251_p10 = scmp.lt.s32.totalorder %s383_s9, 2  ;;  %s87_s20 = sand.u32 1, %s379_s8  }
   0xe   : > { %p447_p11 = por %p61_p7, %p31_p0  ;;  %p451_p12 = por %p67_p8, %p37_p3 }
   0xf   : > { %s231_s21 = sshll.u32 %s383_s9, 7  ;;  %s230_s22 = sshll.u32 %s87_s20, 3 }
  0x10   : > { %s563_s18 = scalar_select %p447_p11, 1, 0 }
  0x11   : > { %s564_s19 = scalar_select %p451_p12, 1, 0 }
  0x12   : > { %s460_s25 = scalar_lea.hbm %s558_s0, %s231_s21  ;;  %s91_s26 = scalar_lea.vmem [#allocation2], %s230_s22 }
  0x13   : > { %s98_s27 = sshll.u32 %s91_s26, 4  ;;  %p464_p13 = pnand %p251_p10, %p436_p5  ;;  %s468_s27 = int_to_ptr.vmem [resolvable:$true] %s98_s27 }
  0x14   : > { %s88_s29 = scalar_lea.sflag [#allocation3], %s87_s20  ;;  %s287_s30 = scalar_lea.hbm %s460_s25, 128 }
  0x15   : > { %p288_p2 = scmp.ne.s32.totalorder %s460_s25, %s287_s30  ;;  %p289_p3 = pneg %p464_p13 }
  0x16   : > { %s292_s4 = scalar_lea.hbm %s558_s0, 256  ;;  %p293_p5 = scmp.lt.u32.totalorder %s460_s25, %s558_s0 }
  0x17   : > { %p290_p4 = pnand %p289_p3, %p288_p2  ;;  %p294_p8 = scmp.lt.u32.totalorder %s292_s4, %s287_s30 }
  0x18   : > { %p296_p9 = scmp.lt.u32.totalorder %s287_s30, %s460_s25 }
  0x19   : > { %p291_p7 = pneg %p290_p4  ;;  %p295_p10 = por %p294_p8, %p293_p5 }
  0x1b   : > { %p297_p0 = por %p296_p9, %p295_p10 }
  0x1d   : > { %p298_p1 = pnand %p297_p0, %p291_p7 }
  0x1f   : > { %301 = shalt.err (!%p298_p1)
}
  0x20   : > { %s302_s13 = scalar_lea.vmem %s468_s27, 128  ;;  %s385_s14 = smov [#allocation2]  }
  0x21   : > { %p303_p2 = scmp.ne.s32.totalorder %s468_s27, %s302_s13  ;;  %s307_s16 = sshll.u32 %s385_s14, 4  ;;  %s308_s16 = int_to_ptr.vmem [resolvable:$false] %s307_s16 }
  0x22   : > { %s309_s20 = scalar_lea.vmem %s308_s16, 256  ;;  %p310_p11 = scmp.lt.s32.totalorder %s468_s27, %s308_s16 }
  0x23   : > { %p305_p4 = pnand %p303_p2, %p289_p3  ;;  %p311_p5 = scmp.lt.s32.totalorder %s309_s20, %s302_s13 }
  0x25   : > { %p306_p12 = pneg %p305_p4  ;;  %p312_p8 = por %p311_p5, %p310_p11 }
  0x27   : > { %p313_p9 = pnand %p312_p8, %p306_p12 }
  0x29   : > { %316 = shalt.err (!%p313_p9)
}
  0x2a   : > { %246 = dma.hbm_to_vmem [thread:$0]  (!%p464_p13), %s460_s25, 128, %s468_s27, %s88_s29  }
  0x2b   : > { %p566_p0 = scmp.lt.s32.totalorder %s383_s9, 3  ;;  %p567_p1 = scmp.ge.s32.totalorder %s383_s9, 1 }
  0x2d   : > { %p104_p3 = pnand %p567_p1, %p566_p0 }
  0x2e   : > { %s502_s21 = sand.u32 (!%p104_p3), 1, %s375_s7  }
  0x2f   : > { %107 = sbr.rel (%p104_p3) target bundleno = 232 (0xe8), region = 24  ;;  %s233_s22 = sshll.u32 (!%p104_p3), %s502_s21, 3 }
  0x30   : > { %s110_s23 = scalar_lea.sflag (!%p104_p3), [#allocation3], %s502_s21  ;;  %s113_s24 = scalar_lea.vmem (!%p104_p3), [#allocation2], %s233_s22 }
  0x36   : > { %362 = dma.done.wait (%p440_p6), %s110_s23, 128  }
  0x37   : > { %364 = vsyncadd (%p440_p6), %s110_s23, 4294967168  ;;  %v132_v0 = vld [vmem:[%s113_s24] sm:$0xff]  ;;  %vm134_vm0 = vcmask 261120   ;;  %s236_s25 = sshll.u32 %s418_s10, 7  ;;  %s131_s26 = scalar_lea.vmem [#allocation5], %s233_s22 }
  0x38   : > { %v133_v1 = vmul.f32 %v132_v0, %v132_v0  ;;  %s157_s27 = sshll.u32 %s131_s26, 4  ;;  %s514_s29 = scalar_lea.hbm %s559_s1, %s236_s25  ;;  %s516_s27 = int_to_ptr.vmem [resolvable:$true] %s157_s27 }
  0x39   : > { %s144_s30 = scalar_lea.sflag [#allocation4], %s502_s21  ;;  %s317_s2 = scalar_lea.vmem %s516_s27, 128 }
  0x3a   : > { %v135_v2 = vsel %vm134_vm0, %v133_v1, 0.0  ;;  %p318_p6 = scmp.ne.s32.totalorder %s516_s27, %s317_s2  ;;  %p568_p11 = scmp.ne.s32.totalorder %s563_s18, 0 }
  0x3b   : > { %136 = vadd.xlane.f32.xlu0 %v135_v2  ;;  %s386_s10 = smov [#allocation5]  }
  0x3c   : > { %p319_p12 = pnand %p318_p6, %p568_p11  ;;  %s321_s3 = sshll.u32 %s386_s10, 4  ;;  %s322_s3 = int_to_ptr.vmem [resolvable:$false] %s321_s3 }
  0x3d   : > { %s323_s4 = scalar_lea.vmem %s322_s3, 256  ;;  %p324_p7 = scmp.lt.s32.totalorder %s516_s27, %s322_s3 }
  0x3e   : > { %p320_p13 = pneg %p319_p12  ;;  %p325_p10 = scmp.lt.s32.totalorder %s323_s4, %s317_s2 }
  0x40   : > { %p326_p2 = por %p325_p10, %p324_p7 }
  0x42   : > { %p327_p4 = pnand %p326_p2, %p320_p13 }
  0xc8   : > { %v137_v3 = vpop.xlane.xlu0 %136 }
  0xc9   : > { %v138_v4 = vmul.f32 0.03125, %v137_v3 }
  0xcb   : > { %v139_v5 = vadd.f32 1e-05, %v138_v4 }
  0xcd   : > { %285 = vrsqrt.f32 %v139_v5 }
  0xd7   : > { %v286_v6 = vpop.eup %285 }
  0xd8   : > { %v141_v7 = vmul.f32 %v286_v6, %v132_v0 }
  0xda   : > { %142 = vst.msk [vmem:[%s131_s26] sm:$0xff] %vm134_vm0, %v141_v7 }
  0xdb   : > { %330 = shalt.err (!%p327_p4)
}
  0xdc   : > { %s331_s5 = scalar_lea.hbm %s514_s29, 128  ;;  %s335_s14 = scalar_lea.hbm %s559_s1, 256 }
  0xdd   : > { %p332_p5 = scmp.ne.s32.totalorder %s514_s29, %s331_s5  ;;  %p336_p0 = scmp.lt.u32.totalorder %s514_s29, %s559_s1 }
  0xde   : > { %p337_p1 = scmp.lt.u32.totalorder %s335_s14, %s331_s5  ;;  %p339_p6 = scmp.lt.u32.totalorder %s331_s5, %s514_s29 }
  0xdf   : > { %p333_p8 = pnand %p332_p5, %p568_p11 }
  0xe0   : > { %p338_p3 = por %p337_p1, %p336_p0 }
  0xe1   : > { %p334_p9 = pneg %p333_p8 }
  0xe2   : > { %p340_p12 = por %p339_p6, %p338_p3 }
  0xe4   : > { %p341_p13 = pnand %p340_p12, %p334_p9 }
  0xe6   : > { %344 = shalt.err (!%p341_p13)
}
  0xe7   : > { %241 = dma.vmem_to_hbm [thread:$0]  (%p568_p11), %s516_s27, 128, %s514_s29, %s144_s30  }
  0xe8 PF: > { %s169_s21 = sand.u32 1, %s371_s6   ;;  %p569_p7 = scmp.ne.s32.totalorder %s564_s19, 0 }
  0xe9   : > { %p570_p10 = scmp.ge.s32.totalorder %s383_s9, 2  ;;  %s170_s22 = scalar_lea.sflag [#allocation4], %s169_s21 }
  0xeb   : > { %p248_p2 = pnand %p570_p10, %p569_p7 }
  0xed   : > { %366 = dma.done.wait (!%p248_p2), %s170_s22, 128  }
  0xee   : > { %368 = vsyncadd (!%p248_p2), %s170_s22, 4294967168  ;;  %p14_p4 = scmp.ge.s32.totalorder %s422_s12, 4   ;;  %s571_s6 = smov %s375_s7 }
  0xef   : > { %s572_s7 = smov %s379_s8  ;;  %s573_s8 = smov %s434_s15 }
  0xf0   : > { %s574_s9 = smov %s422_s12  ;;  %16 = sbr.rel (!%p14_p4) target bundleno = 5 (0x5), region = 69 }
  0xf7   :  { %175 = vsyncpa [#allocation3], 1 }
  0xf8   :  { %177 = vsyncpa [#allocation3 + $0x1], 1 }
  0xf9   :  { %178 = vsyncpa [#allocation4], 1 }
  0xfa   :  { %180 = vsyncpa [#allocation4 + $0x1], 1 }

</bundles_post_ra>
